<compile_context>
chip_gen: v7x
topology: tpu7x:2x2x1
jax: 0.10.0
libtpu: 0.0.40
codegen_flags: <defaults>
</compile_context>

<pallas_src>
from functools import partial

import jax
import jax.numpy as jnp
from jax.experimental import pallas as pl
from jax.experimental.pallas import tpu as pltpu

_X_BLOCK_BYTES_BUDGET = 6 * 1024 * 1024   # per x buffer (double-buffered by Pallas)
_VMEM_LIMIT_BYTES = 32 * 1024 * 1024      # safe scoped-VMEM limit on v5e/v6e/v7x


def _linreg2d_kernel(x_ref, w_ref, b_ref, o_ref, acc_ref, *, inv_hw):
    # x_ref: (TB, C, THW)  w_ref: (C, O)  b_ref: (1, O)
    # o_ref: (TB, O)       acc_ref: (TB, C) f32 scratch (persists over HW steps)
    hw_step = pl.program_id(1)

    @pl.when(hw_step == 0)
    def _init():
        acc_ref[...] = jnp.zeros_like(acc_ref)

    # Streaming spatial sum (lane-axis reduce on the XLU), accumulated in f32.
    acc_ref[...] += jnp.sum(x_ref[...].astype(jnp.float32), axis=-1)

    @pl.when(hw_step == pl.num_programs(1) - 1)
    def _finalize():
        pooled = acc_ref[...] * inv_hw                                  # (TB, C)
        # Tiny contraction (C x out_dim); negligible FLOPs vs. the HBM stream.
        y = jnp.dot(pooled, w_ref[...].astype(jnp.float32),
                    preferred_element_type=jnp.float32)                 # (TB, O)
        y = y + b_ref[...].astype(jnp.float32)
        # torch.sigmoid(x) * 2 - 1  (== tanh(x/2), but keep the literal form)
        o_ref[...] = (jax.nn.sigmoid(y) * 2.0 - 1.0).astype(o_ref.dtype)


def _pick_b_tile(B):
    # Prefer a multiple-of-8 divisor (keeps the x block's leading dim and the
    # (TB, out_dim) output block sublane-friendly); otherwise use the full batch.
    for t in (64, 32, 16, 8):
        if B % t == 0:
            return t
    return B


def _pick_hw_tile(HW, tb, C, itemsize):
    # Largest multiple of 128 that divides HW and keeps the x block within the
    # VMEM byte budget; fall back to the full spatial extent if HW % 128 != 0
    # (then the block equals the full array dim, which is always legal).
    if HW % 128 != 0:
        return HW
    per_col_bytes = tb * C * itemsize
    cap = max(128, (_X_BLOCK_BYTES_BUDGET // max(per_col_bytes, 1)) // 128 * 128)
    thw = 128
    for t in range(128, HW + 1, 128):
        if HW % t == 0 and t <= cap:
            thw = t
    return thw


def linear_regressor_2d(x, w, b, num_keypoints, *, b_tile=None, hw_tile=None):
    """x: (B, C, H, W) NCHW, w: (C, out_dim), b: (out_dim,). Returns (B, K, 2)."""
    B, C, H, W = x.shape
    # avg_pool2d(kernel_size=W) is a global average pool only for square inputs.
    # TODO(synk): non-square inputs would need H//W pooled windows feeding a wider FC.
    assert H == W, "avg_pool2d(kernel_size=W) acts as global pool only for square inputs"
    out_dim = w.shape[1]
    assert out_dim == 2 * num_keypoints
    assert w.shape[0] == C

    HW = H * W
    x_flat = x.reshape(B, C, HW)
    b2 = b.reshape(1, out_dim)

    tb = b_tile if b_tile is not None else _pick_b_tile(B)
    thw = hw_tile if hw_tile is not None else _pick_hw_tile(HW, tb, C, x.dtype.itemsize)
    assert B % tb == 0, "b_tile must divide the batch"
    assert HW % thw == 0, "hw_tile must divide H*W"
    assert thw == HW or thw % 128 == 0, "hw_tile must be a multiple of 128 (lane axis)"

    grid = (B // tb, HW // thw)  # (parallel B-tiles, HW reduction steps — last)

    out = pl.pallas_call(
        partial(_linreg2d_kernel, inv_hw=1.0 / HW),
        out_shape=jax.ShapeDtypeStruct((B, out_dim), x.dtype),
        grid_spec=pltpu.PrefetchScalarGridSpec(
            num_scalar_prefetch=0,
            grid=grid,
            in_specs=[
                # x: advances over both B-tiles and HW-tiles (streamed).
                pl.BlockSpec((tb, C, thw), lambda i, j: (i, 0, j)),
                # w, b: constant over both grid axes -> stay VMEM-resident.
                pl.BlockSpec((C, out_dim), lambda i, j: (0, 0)),
                pl.BlockSpec((1, out_dim), lambda i, j: (0, 0)),
            ],
            # Output block constant over the HW axis: written only at finalize,
            # DMA'd back once per B-tile.
            out_specs=pl.BlockSpec((tb, out_dim), lambda i, j: (i, 0)),
            scratch_shapes=[pltpu.VMEM((tb, C), jnp.float32)],
        ),
        compiler_params=pltpu.CompilerParams(
            dimension_semantics=("parallel", "arbitrary"),
            vmem_limit_bytes=_VMEM_LIMIT_BYTES,
        ),
    )(x_flat, w, b2)

    # final .view(-1, num_keypoints, 2)
    return out.reshape(-1, num_keypoints, 2)


if __name__ == "__main__":
    # Small shapes consistent with the module's forward (NCHW, square spatial).
    B, C, H, W = 2, 4, 16, 16
    num_keypoints = 4
    out_dim = 2 * num_keypoints

    key = jax.random.PRNGKey(0)
    kx, kw, kb = jax.random.split(key, 3)

    x = jax.random.normal(kx, (B, C, H, W), dtype=jnp.float32)
    # Deterministic init of the (lazy) Linear layer: in_features = C after global pool.
    w = jax.random.normal(kw, (C, out_dim), dtype=jnp.float32) * 0.1
    b = jax.random.normal(kb, (out_dim,), dtype=jnp.float32) * 0.1

    # hw_tile=128 -> two spatial steps at this size, exercising the streaming
    # accumulator + pl.when finalize path (auto-tiling would pick one 256 block).
    y = linear_regressor_2d(x, w, b, num_keypoints, hw_tile=128)
    y = jax.block_until_ready(y)

    # Pure-JAX reference check (same math).
    pooled_ref = jnp.mean(x.reshape(B, C, H * W), axis=-1)
    y_ref = (jax.nn.sigmoid(pooled_ref @ w + b) * 2.0 - 1.0).reshape(-1, num_keypoints, 2)
    assert y.shape == (B, num_keypoints, 2)
    assert jnp.allclose(y, y_ref, atol=1e-5), "mismatch vs reference"

    print("KERNEL_OK")
</pallas_src>

<mosaic_0001>
module attributes {stable_mosaic.version = 11 : i64} {
  func.func @_linreg2d_kernel(%arg0: i32, %arg1: i32, %arg2: memref<2x4x128xf32, #tpu.memory_space<vmem>>, %arg3: memref<4x8xf32, #tpu.memory_space<vmem>>, %arg4: memref<1x8xf32, #tpu.memory_space<vmem>>, %arg5: memref<2x8xf32, #tpu.memory_space<vmem>>, %arg6: memref<2x4xf32, #tpu.memory_space<vmem>>) attributes {dimension_semantics = [#tpu.dimension_semantics<parallel>, #tpu.dimension_semantics<arbitrary>], iteration_bounds = array<i64: 1, 2>, scalar_prefetch = 0 : i64, scratch_operands = 1 : i64, tpu.core_type = #tpu.core_type<tc>, window_params = [{transform_indices = @transform_0, window_bounds = array<i64: 2, 4, 128>}, {pipeline_mode = #tpu.pipeline_mode<synchronous>, transform_indices = @transform_1, window_bounds = array<i64: 4, 8>}, {pipeline_mode = #tpu.pipeline_mode<synchronous>, transform_indices = @transform_2, window_bounds = array<i64: 1, 8>}, {transform_indices = @transform_3, window_bounds = array<i64: 2, 8>}]} {
    %c0_i32 = arith.constant 0 : i32
    %0 = arith.cmpi eq, %arg1, %c0_i32 : i32
    %1 = arith.extui %0 : i1 to i32
    %c0_i32_0 = arith.constant 0 : i32
    %2 = arith.cmpi ne, %1, %c0_i32_0 : i32
    scf.if %2 {
      %cst_8 = arith.constant 0.000000e+00 : f32
      %11 = vector.broadcast %cst_8 : f32 to vector<2x4xf32>
      %c0_9 = arith.constant 0 : index
      %c0_10 = arith.constant 0 : index
      %12 = vector.load %arg6[%c0_9, %c0_10] : memref<2x4xf32, #tpu.memory_space<vmem>>, vector<2x4xf32>
      tpu.vector_store %arg6[%c0_9, %c0_10], %11 {strides = array<i32>} : memref<2x4xf32, #tpu.memory_space<vmem>>, vector<2x4xf32>,
    } else {
    }
    %c0 = arith.constant 0 : index
    %c0_1 = arith.constant 0 : index
    %3 = vector.load %arg6[%c0, %c0_1] : memref<2x4xf32, #tpu.memory_space<vmem>>, vector<2x4xf32>
    %c0_2 = arith.constant 0 : index
    %c0_3 = arith.constant 0 : index
    %c0_4 = arith.constant 0 : index
    %4 = vector.load %arg2[%c0_2, %c0_3, %c0_4] : memref<2x4x128xf32, #tpu.memory_space<vmem>>, vector<2x4x128xf32>
    %cst = arith.constant dense<0.000000e+00> : vector<2x4xf32>
    %5 = vector.multi_reduction <add>, %4, %cst [2] : vector<2x4x128xf32> to vector<2x4xf32>
    %6 = arith.addf %3, %5 : vector<2x4xf32>
    %c0_5 = arith.constant 0 : index
    %c0_6 = arith.constant 0 : index
    %7 = vector.load %arg6[%c0_5, %c0_6] : memref<2x4xf32, #tpu.memory_space<vmem>>, vector<2x4xf32>
    tpu.vector_store %arg6[%c0_5, %c0_6], %6 {strides = array<i32>} : memref<2x4xf32, #tpu.memory_space<vmem>>, vector<2x4xf32>,
    %c1_i32 = arith.constant 1 : i32
    %8 = arith.cmpi eq, %arg1, %c1_i32 : i32
    %9 = arith.extui %8 : i1 to i32
    %c0_i32_7 = arith.constant 0 : i32
    %10 = arith.cmpi ne, %9, %c0_i32_7 : i32
    scf.if %10 {
      %c0_8 = arith.constant 0 : index
      %c0_9 = arith.constant 0 : index
      %11 = vector.load %arg6[%c0_8, %c0_9] : memref<2x4xf32, #tpu.memory_space<vmem>>, vector<2x4xf32>
      %cst_10 = arith.constant 3.906250e-03 : f32
      %12 = vector.broadcast %cst_10 : f32 to vector<2x4xf32>
      %13 = arith.mulf %11, %12 : vector<2x4xf32>
      %c0_11 = arith.constant 0 : index
      %c0_12 = arith.constant 0 : index
      %14 = vector.load %arg3[%c0_11, %c0_12] : memref<4x8xf32, #tpu.memory_space<vmem>>, vector<4x8xf32>
      %cst_13 = arith.constant dense<0.000000e+00> : vector<2x8xf32>
      %15 = tpu.matmul %13, %14, %cst_13 {dimension_numbers = #tpu.dot_dimension_numbers<[1], [0], [0], [1], [0, 0, 1, 1], [], []>} : vector<2x4xf32>, vector<4x8xf32>, vector<2x8xf32> -> vector<2x8xf32>
      %c0_14 = arith.constant 0 : index
      %c0_15 = arith.constant 0 : index
      %16 = vector.load %arg4[%c0_14, %c0_15] : memref<1x8xf32, #tpu.memory_space<vmem>>, vector<1x8xf32>
      %17 = vector.broadcast %16 : vector<1x8xf32> to vector<2x8xf32>
      %18 = arith.addf %15, %17 : vector<2x8xf32>
      %19 = arith.negf %18 : vector<2x8xf32>
      %20 = math.exp %19 : vector<2x8xf32>
      %cst_16 = arith.constant 1.000000e+00 : f32
      %21 = vector.broadcast %cst_16 : f32 to vector<2x8xf32>
      %22 = arith.addf %21, %20 : vector<2x8xf32>
      %23 = arith.divf %21, %22 : vector<2x8xf32>
      %cst_17 = arith.constant 2.000000e+00 : f32
      %24 = vector.broadcast %cst_17 : f32 to vector<2x8xf32>
      %25 = arith.mulf %23, %24 : vector<2x8xf32>
      %cst_18 = arith.constant 1.000000e+00 : f32
      %26 = vector.broadcast %cst_18 : f32 to vector<2x8xf32>
      %27 = arith.subf %25, %26 : vector<2x8xf32>
      %c0_19 = arith.constant 0 : index
      %c0_20 = arith.constant 0 : index
      %28 = vector.load %arg5[%c0_19, %c0_20] : memref<2x8xf32, #tpu.memory_space<vmem>>, vector<2x8xf32>
      tpu.vector_store %arg5[%c0_19, %c0_20], %27 {strides = array<i32>} : memref<2x8xf32, #tpu.memory_space<vmem>>, vector<2x8xf32>,
    } else {
    }
    return
  }
  func.func @transform_0(%arg0: i32, %arg1: i32) -> (i32, i32, i32) {
    %c0_i32 = arith.constant 0 : i32
    %c0_i32_0 = arith.constant 0 : i32
    return %arg0, %c0_i32, %arg1 : i32, i32, i32
  }
  func.func @transform_1(%arg0: i32, %arg1: i32) -> (i32, i32) {
    %c0_i32 = arith.constant 0 : i32
    %c0_i32_0 = arith.constant 0 : i32
    %c0_i32_1 = arith.constant 0 : i32
    return %c0_i32, %c0_i32_0 : i32, i32
  }
  func.func @transform_2(%arg0: i32, %arg1: i32) -> (i32, i32) {
    %c0_i32 = arith.constant 0 : i32
    %c0_i32_0 = arith.constant 0 : i32
    %c0_i32_1 = arith.constant 0 : i32
    return %c0_i32, %c0_i32_0 : i32, i32
  }
  func.func @transform_3(%arg0: i32, %arg1: i32) -> (i32, i32) {
    %c0_i32 = arith.constant 0 : i32
    %c0_i32_0 = arith.constant 0 : i32
    return %arg0, %c0_i32 : i32, i32
  }
}

</mosaic_0001>

<bundles_post_ra>
// kernel: tpu_custom_call.1
= control target key start
LH: loop header
LB: loop body
LE: loop exit
PB: predicated region body
PF: predicated region fallthrough
CT: control target
= control target key end

     0   :  { %8 = vsyncpa [#allocation4], 0  ;;  %s909_s0 = inlined_call_operand.hbm [shape: f32[2,4,256], index: 0, kind: input, shape index: {}]   ;;  %s910_s1 = inlined_call_operand.hbm [shape: f32[4,8], index: 1, kind: input, shape index: {}]   ;;  %s911_s2 = inlined_call_operand.vmem [shape: f32[1,8], index: 2, kind: input, shape index: {}]   ;;  %s912_s3 = inlined_call_operand.hbm [shape: f32[2,8], index: 3, kind: output, shape index: {}]  }
   0x1   :  { %10 = vsyncpa [#allocation4 + $0x1], 0 }
   0x2   :  { %11 = vsyncpa [#allocation7], 0 }
   0x3   :  { %12 = vsyncpa [#allocation5], 0  ;;  %s712_s12 = smov 0   ;;  %s714_s13 = smov 0  }
   0x4   :  { %s716_s14 = smov 0   ;;  %s718_s15 = smov 0  }
   0x5   :  { %s720_s16 = smov 0   ;;  %s722_s17 = smov 0  }
   0x6 LB: > { %s429_s18 = sadd.s32 4294967295, %s681_s17   ;;  %s39_s19 = sadd.s32 1, %s669_s14  ;;  %s681_s17 = sphi %s722_s17, %s18_s17   ;;  %s677_s16 = sphi %s720_s16, %s932_s16   ;;  %s673_s15 = sphi %s718_s15, %s931_s15   ;;  %s669_s14 = sphi %s716_s14, %s930_s14   ;;  %s665_s13 = sphi %s714_s13, %s929_s13   ;;  %s661_s12 = sphi %s712_s12, %s928_s12  }
   0x7   : > { %p46_p0 = scmp.ne.s32.totalorder %s669_s14, %s665_s13  ;;  %p47_p1 = scmp.eq.s32.totalorder %s681_s17, 0 }
   0x8   : > { %p52_p2 = scmp.ne.s32.totalorder %s665_s13, %s661_s12  ;;  %p748_p3 = scmp.eq.s32.totalorder %s429_s18, 0 }
   0x9   : > { %p48_p4 = por %p47_p1, %p46_p0  ;;  %p430_p5 = scmp.ge.s32.totalorder %s681_s17, 1 }
   0xa   : > { %s918_s20 = scalar_select %p748_p3, 1, 0 }
   0xb   : > { %p755_p6 = por %p748_p3, %p52_p2  ;;  %p131_p7 = scmp.lt.s32.totalorder %s681_s17, 3 }
   0xc   : > { %s683_s23 = smov [#allocation6]   ;;  %p475_p10 = scmp.lt.s32.totalorder %s681_s17, 2 }
   0xd   : > { %s919_s21 = scalar_select %p755_p6, 1, 0 }
   0xe   : > { %p760_p8 = pnand %p430_p5, %p131_p7  ;;  %s144_s24 = sshll.u32 %s683_s23, 4  ;;  %s145_s24 = int_to_ptr.vmem [resolvable:$true] %s144_s24 }
   0xf   : > { %s158_s25 = sand.u32 1, %s669_s14   ;;  %p774_p12 = pnand %p475_p10, %p48_p4 }
  0x10   : > { %s920_s22 = scalar_select %p760_p8, 1, 0 }
  0x11   : > { %p466_p9 = pneg %p760_p8  ;;  %s539_s30 = scalar_lea.hbm %s910_s1, 64 }
  0x12   : > { %s922_s27 = scalar_select %p774_p12, 1, 0 }
  0x13   : > { %p770_p11 = pnand %p466_p9, %p748_p3  ;;  %p540_p13 = scmp.ne.s32.totalorder %s910_s1, %s539_s30 }
  0x14   : > { %p546_p5 = scmp.lt.u32.totalorder %s539_s30, %s910_s1 }
  0x15   : > { %p541_p0 = pneg %p770_p11 }
  0x17   : > { %p542_p1 = pnand %p541_p0, %p540_p13 }
  0x19   : > { %p543_p2 = pneg %p542_p1 }
  0x1b   : > { %p548_p4 = pnand %p546_p5, %p543_p2 }
  0x1d   : > { %551 = shalt.err (!%p548_p4)
}
  0x1e   : > { %s552_s8 = scalar_lea.vmem %s145_s24, 64  ;;  %p560_p3 = scmp.lt.s32.totalorder %s145_s24, %s145_s24 }
  0x1f   : > { %p553_p7 = scmp.ne.s32.totalorder %s145_s24, %s552_s8  ;;  %p561_p6 = scmp.lt.s32.totalorder %s552_s8, %s552_s8 }
  0x21   : > { %p555_p9 = pnand %p553_p7, %p541_p0  ;;  %p562_p8 = por %p561_p6, %p560_p3 }
  0x23   : > { %p556_p10 = pneg %p555_p9 }
  0x25   : > { %p563_p12 = pnand %p562_p8, %p556_p10 }
  0x27   : > { %566 = shalt.err (!%p563_p12)
}
  0x28   : > { %469 = dma.hbm_to_vmem [thread:$0]  (!%p770_p11), %s910_s1, 64, %s145_s24, [#allocation7]  }
  0x29   : > { %s27_s11 = sadd.s32 1, %s677_s16  ;;  %s433_s12 = sshll.u32 %s158_s25, 3 }
  0x2a   : > { %p28_p3 = scmp.ge.s32.totalorder %s27_s11, 2  ;;  %s434_s23 = sshll.u32 %s677_s16, 6 }
  0x2b   : > { %s162_s28 = scalar_lea.vmem [#allocation3], %s433_s12  ;;  %s803_s4 = scalar_lea.hbm %s909_s0, %s434_s23 }
  0x2c   : > { %s171_s26 = sshll.u32 %s162_s28, 4  ;;  %s934_s11 = smov (%p28_p3, %s27_s11), 0  ;;  %s805_s26 = int_to_ptr.vmem [resolvable:$true] %s171_s26 }
  0x2d   : > { %s35_s24 = ssub.s32 %s677_s16, %s934_s11  ;;  %s816_s6 = scalar_lea.sflag [#allocation4], %s158_s25 }
  0x2e   : > { %p37_p6 = scmp.eq.s32.totalorder %s35_s24, 0  ;;  %s567_s7 = scalar_lea.hbm %s803_s4, 128 }
  0x2f   : > { %p568_p8 = scmp.ne.s32.totalorder %s803_s4, %s567_s7  ;;  %p923_p11 = scmp.ne.s32.totalorder %s922_s27, 0 }
  0x30   : > { %s812_s5 = scalar_select %p37_p6, %s669_s14, %s39_s19  }
  0x31   : > { %p569_p12 = pneg %p923_p11  ;;  %s572_s10 = scalar_lea.hbm %s909_s0, 256 }
  0x32   : > { %p573_p1 = scmp.lt.u32.totalorder %s803_s4, %s909_s0  ;;  %p574_p2 = scmp.lt.u32.totalorder %s572_s10, %s567_s7 }
  0x33   : > { %p570_p13 = pnand %p569_p12, %p568_p8  ;;  %p576_p4 = scmp.lt.u32.totalorder %s567_s7, %s803_s4 }
  0x34   : > { %p575_p5 = por %p574_p2, %p573_p1 }
  0x35   : > { %p571_p0 = pneg %p570_p13 }
  0x36   : > { %p577_p7 = por %p576_p4, %p575_p5 }
  0x38   : > { %p578_p9 = pnand %p577_p7, %p571_p0 }
  0x3a   : > { %581 = shalt.err (!%p578_p9)
}
  0x3b   : > { %s582_s19 = scalar_lea.vmem %s805_s26, 128  ;;  %s684_s25 = smov [#allocation3]  }
  0x3c   : > { %p583_p10 = scmp.ne.s32.totalorder %s805_s26, %s582_s19  ;;  %s587_s28 = sshll.u32 %s684_s25, 4  ;;  %s588_s28 = int_to_ptr.vmem [resolvable:$false] %s587_s28 }
  0x3d   : > { %s589_s29 = scalar_lea.vmem %s588_s28, 256  ;;  %p590_p8 = scmp.lt.s32.totalorder %s805_s26, %s588_s28 }
  0x3e   : > { %p585_p3 = pnand %p583_p10, %p569_p12  ;;  %p591_p13 = scmp.lt.s32.totalorder %s589_s29, %s582_s19 }
  0x40   : > { %p586_p6 = pneg %p585_p3  ;;  %p592_p1 = por %p591_p13, %p590_p8 }
  0x42   : > { %p593_p2 = pnand %p592_p1, %p586_p6 }
  0x44   : > { %596 = shalt.err (!%p593_p2)
}
  0x45   : > { %s685_s30 = smov 128   ;;  %s686_s24 = smov 64  }
  0x46   : > { %s687_s7 = smov 4   ;;  %p924_p12 = scmp.ne.s32.totalorder %s920_s22, 0 }
  0x47   : > { %473 = dma.hbm_to_vmem [thread:$0]  (!%p923_p11), %s803_s4, 128, %s805_s26, %s816_s6, %s685_s30, %s686_s24, %s687_s7  }
  0x48   : > { %183 = sbr.rel (%p924_p12) target bundleno = 525 (0x20d), region = 32  ;;  %s185_s8 = sand.u32 (!%p924_p12), 1, %s665_s13  }
  0x49   : > { %s436_s9 = sshll.u32 (!%p924_p12), %s185_s8, 3  ;;  %s186_s10 = scalar_lea.sflag (!%p924_p12), [#allocation4], %s185_s8 }
  0x4a   : > { %s189_s12 = scalar_lea.vmem (!%p924_p12), [#allocation3], %s436_s9  ;;  %p925_p0 = scmp.ne.s32.totalorder (!%p924_p12), %s919_s21, 0 }
  0x4f   : > { %648 = dma.done.wait (%p925_p0), %s186_s10, 128  }
  0x50   : > { %650 = vsyncadd (%p925_p0), %s186_s10, 4294967168  ;;  %p926_p5 = scmp.ne.s32.totalorder %s918_s20, 0 }
  0x52   : > { %652 = dma.done.wait (%p926_p5), [#allocation7], 64  }
  0x53   : > { %654 = vsyncadd (%p926_p5), [#allocation7], 4294967232  ;;  %p438_p11 = scmp.ne.s32.totalorder %s673_s15, 0 }
  0x54   : > { %vm216_vm0 = vcmask (!%p438_p11), 25600   ;;  %v688_v0 = vmov (!%p438_p11), 0.0  }
  0x55   : > { %215 = sbr.rel (%p438_p11) target bundleno = 92 (0x5c), region = 44  ;;  %217 = vst.msk [vmem:[#allocation2] sm:$0x3] (!%p438_p11), %vm216_vm0, %v688_v0 }
  0x5c PF: > { %v219_v1 = vld [vmem:[%s189_s12] sm:$0xf]  ;;  %vm221_vm1 = vcmask 1043456   ;;  %v220_v2 = vld [vmem:[%s189_s12 + $0x4] sm:$0xf]  ;;  %v230_v5 = vlaneseq  ;;  %vm240_vm2 = vcmask 1041409  }
  0x5d   : > { %v222_v3 = vsel %vm221_vm1, %v219_v1, 0.0  ;;  %v225_v4 = vsel %vm221_vm1, %v220_v2, 0.0  ;;  %v218_v12 = vld [vmem:[#allocation2] sm:$0x3]  ;;  %vm244_vm3 = vcmask 25600   ;;  %p439_p4 = scmp.ne.s32.totalorder %s673_s15, 1 }
  0x5e   : > { %223 = vadd.xlane.f32.xlu0 %v222_v3  ;;  %v231_v6 = vand.u32 127, %v230_v5  ;;  %v233_v7 = vshrl.u32 %v230_v5, 7  ;;  %v252_v16 = vld [vmem:[#allocation6] sm:$0xf] (!%p439_p4)  ;;  %v689_v18 = vmov (!%p439_p4), 0.0   ;;  %vm690_vm4 = vmmov (!%p439_p4), 0  }
  0x5f   : > { %451 = vmatprep.subr.mxu0 (!%p439_p4), %v689_v18  ;;  %453 = vmatprep.mubr.msk.f32.mxu0 (!%p439_p4), %vm690_vm4, %v689_v18  ;;  %vm260_vm5 = vcmask (!%p439_p4), 31744   ;;  %v440_v20 = vld [vmem:[%s911_s2] ss:$0 sm:$0xff] (!%p439_p4)  ;;  %vm345_vm6 = vcmask (!%p439_p4), 58368  }
  0x60   : > { %v234_v9 = vsub.s32 %v231_v6, %v233_v7  ;;  %452 = vmatpush3.msk.msra.mxu0 (!%p439_p4), %vm221_vm1, %v252_v16 }
  0x62   : > { %226 = vadd.xlane.f32.xlu0 %v225_v4 }
  0xeb   : > { %v224_v8 = vpop.xlane.xlu0 %223 }
  0xec   : > { %v235_v11 = vrot.slane %v224_v8, %v234_v9 }
  0xef   : > { %v227_v10 = vpop.xlane.xlu0 %226  ;;  %249 = sbr.rel (%p439_p4) target bundleno = 500 (0x1f4), region = 48 }
  0xf0   : > { %v239_v13 = vrot.slane %v227_v10, %v234_v9 }
  0xf2   : > { %v241_v14 = vsel %vm240_vm2, %v239_v13, %v235_v11 }
  0xf3   : > { %v243_v15 = vadd.f32 %v241_v14, %v218_v12 }
  0xf5   : > { %245 = vst.msk [vmem:[#allocation2] sm:$0x3] %vm244_vm3, %v243_v15 }
  0xfc   : > { %v250_v17 = vld [vmem:[#allocation2] sm:$0x3] }
  0xfd   : > { %v251_v19 = vmul.f32 0.00390625, %v250_v17 }
  0xff   : > { %454 = vmatmul.mubr.msk.f32.vlgmr.msra.gmra.mrb[0].mxu0 %vm260_vm5, %v251_v19 }
 0x1d2   : > { %v333_v21 = vpop.f32.mrb[0].mxu0 }
 0x1d3   : > { %v334_v22 = vadd.f32 %v440_v20, %v333_v21  ;;  %v455_v23 = vpop.f32.mrb[1].mxu0 }
 0x1d5   : > { %v443_v24 = vmul.f32 -1.442695, %v334_v22 }
 0x1d7   : > { %535 = vpow2.f32 %v443_v24 }
 0x1e1   : > { %v536_v25 = vpop.eup %535 }
 0x1e2   : > { %v340_v26 = vadd.f32 1.0, %v536_v25 }
 0x1e4   : > { %537 = vrcp.f32 %v340_v26 }
 0x1ee   : > { %v538_v27 = vpop.eup %537 }
 0x1ef   : > { %v343_v28 = vmul.f32 2.0, %v538_v27 }
 0x1f1   : > { %v444_v29 = vadd.f32 -1.0, %v343_v28 }
 0x1f3   : > { %346 = vst.msk [vmem:[#allocation8] sm:$0x3] %vm345_vm6, %v444_v29 }
 0x1f4 PF: > { %p865_p7 = scmp.eq.s32.totalorder %s429_s18, 1  ;;  %s691_s22 = smov [#allocation8]  }
 0x1f5   : > { %s356_s27 = sshll.u32 %s691_s22, 4  ;;  %s357_s27 = int_to_ptr.vmem [resolvable:$true] %s356_s27 }
 0x1f6   : > { %s597_s26 = scalar_lea.vmem %s357_s27, 32  ;;  %p604_p6 = scmp.lt.s32.totalorder %s357_s27, %s357_s27 }
 0x1f7   : > { %p598_p9 = scmp.ne.s32.totalorder %s357_s27, %s597_s26  ;;  %p605_p8 = scmp.lt.s32.totalorder %s597_s26, %s597_s26 }
 0x1f9   : > { %p599_p10 = pnand %p598_p9, %p865_p7  ;;  %p606_p13 = por %p605_p8, %p604_p6 }
 0x1fb   : > { %p600_p3 = pneg %p599_p10 }
 0x1fd   : > { %p607_p1 = pnand %p606_p13, %p600_p3 }
 0x1ff   : > { %610 = shalt.err (!%p607_p1)
}
 0x200   : > { %s611_s18 = scalar_lea.hbm %s912_s3, 32 }
 0x201   : > { %p612_p2 = scmp.ne.s32.totalorder %s912_s3, %s611_s18  ;;  %p617_p5 = scmp.lt.u32.totalorder %s611_s18, %s912_s3 }
 0x203   : > { %p613_p12 = pnand %p612_p2, %p865_p7 }
 0x205   : > { %p614_p0 = pneg %p613_p12 }
 0x207   : > { %p619_p11 = pnand %p617_p5, %p614_p0 }
 0x209   : > { %622 = shalt.err (!%p619_p11)
}
 0x20a   : > { %463 = dma.vmem_to_hbm [thread:$0]  (%p865_p7), %s357_s27, 32, %s912_s3, [#allocation5]  }
 0x20b   : > { %656 = dma.done.wait (%p865_p7), [#allocation5], 32  }
 0x20c   : > { %658 = vsyncadd (%p865_p7), [#allocation5], 4294967264 }
 0x20d PF: > { %s18_s17 = sadd.s32 1, %s681_s17   ;;  %s928_s12 = smov %s665_s13 }
 0x20e   : > { %p15_p4 = scmp.ge.s32.totalorder %s18_s17, 4   ;;  %s929_s13 = smov %s669_s14 }
 0x20f   : > { %s930_s14 = smov %s812_s5  ;;  %s931_s15 = smov %s677_s16 }
 0x210   : > { %s932_s16 = smov %s934_s11  ;;  %17 = sbr.rel (!%p15_p4) target bundleno = 6 (0x6), region = 82 }
 0x217   :  { %369 = vsyncpa [#allocation4], 1 }
 0x218   :  { %371 = vsyncpa [#allocation4 + $0x1], 1 }
 0x219   :  { %372 = vsyncpa [#allocation7], 1 }
 0x21a   :  { %373 = vsyncpa [#allocation5], 1 }
 0x21b   :  { %375 = vsyncpa [#allocation5 + $0x1], 1 }

</bundles_post_ra>
